<compile_context>
chip_gen: v5e
topology: v5e:2x2
jax: 0.10.0
libtpu: 0.0.40
codegen_flags: <defaults>
</compile_context>

<pallas_src>
import math

import jax
import jax.numpy as jnp
from jax.experimental import pallas as pl
from jax.experimental.pallas import tpu as pltpu


def _pe_add_kernel(x_ref, pe_ref, o_ref):
    # x_ref / o_ref: (TS, D) blocks (unit batch dim squeezed); pe_ref: (TS, D).
    # Pure streaming add at the HBM roofline; no transcendentals on the hot path.
    o_ref[...] = x_ref[...] + pe_ref[...]


def _sinusoidal_pe(seq_len: int, d_model: int, dtype) -> jax.Array:
    """Sinusoidal PE table identical to the PyTorch buffer (exact sin/cos, f32 math)."""
    position = jnp.arange(seq_len, dtype=jnp.float32)[:, None]                   # [S, 1]
    div_term = jnp.exp(jnp.arange(0, d_model, 2, dtype=jnp.float32)
                       * (-math.log(10000.0) / d_model))                         # [ceil(D/2)]
    angles = position * div_term                                                 # [S, ceil(D/2)]
    pe = jnp.zeros((seq_len, d_model), jnp.float32)
    pe = pe.at[:, 0::2].set(jnp.sin(angles))
    pe = pe.at[:, 1::2].set(jnp.cos(angles[:, : d_model // 2]))
    return pe.astype(dtype)


def positional_encoding_add(x: jax.Array, *,
                            target_block_bytes: int = 4 * 1024 * 1024) -> jax.Array:
    """x: [batch, seq, d_model] -> x + sinusoidal positional encoding (same dtype)."""
    B, S, D = x.shape
    itemsize = jnp.dtype(x.dtype).itemsize
    sublane = 8 if itemsize >= 4 else (16 if itemsize == 2 else 32)

    # PE table computed once (like the PyTorch registered buffer), streamed as input.
    pe = _sinusoidal_pe(S, D, x.dtype)

    # Sequence tile: bytes-capped only (no arbitrary max_seq_tile cap).  Prefer at
    # least two sequence tiles so the "parallel" seq axis can span both v7x cores.
    ts_cap = max(sublane, target_block_bytes // max(1, D * itemsize))
    if S > 2 * sublane:
        ts_cap = min(ts_cap, -(-S // 2))              # ceil(S / 2)
    ts_cap = max(sublane, (ts_cap // sublane) * sublane)
    TS = S if S <= ts_cap else ts_cap

    num_seq_tiles = pl.cdiv(S, TS)
    grid = (num_seq_tiles, B)                          # batch innermost: pe re-DMA skipped

    # VMEM budget: in/out/pe each double buffered ~= 6 x block bytes (+ headroom).
    block_bytes = TS * D * itemsize
    vmem_bytes = int(min(60 * 1024 * 1024,
                         max(16 * 1024 * 1024, 6 * block_bytes + (4 << 20))))

    return pl.pallas_call(
        _pe_add_kernel,
        out_shape=jax.ShapeDtypeStruct((B, S, D), x.dtype),
        grid=grid,
        in_specs=[
            pl.BlockSpec((None, TS, D), lambda s, b: (b, s, 0)),   # x  (unit batch squeezed)
            pl.BlockSpec((TS, D), lambda s, b: (s, 0)),            # pe (constant across batch)
        ],
        out_specs=pl.BlockSpec((None, TS, D), lambda s, b: (b, s, 0)),
        compiler_params=pltpu.CompilerParams(
            dimension_semantics=("parallel", "parallel"),
            vmem_limit_bytes=vmem_bytes),
        cost_estimate=pl.CostEstimate(
            flops=B * S * D,
            transcendentals=0,
            bytes_accessed=(2 * B * S * D + S * D) * itemsize),
    )(x, pe)


def _reference(x: jax.Array) -> jax.Array:
    """Pure-JAX reference mirroring the PyTorch module exactly."""
    B, S, D = x.shape
    position = jnp.arange(S, dtype=jnp.float32)[:, None]
    div_term = jnp.exp(jnp.arange(0, D, 2, dtype=jnp.float32) * (-math.log(10000.0) / D))
    pe = jnp.zeros((S, D), jnp.float32)
    pe = pe.at[:, 0::2].set(jnp.sin(position * div_term))
    pe = pe.at[:, 1::2].set(jnp.cos(position * div_term))
    return x + pe[None, :, :]


if __name__ == "__main__":
    key = jax.random.PRNGKey(0)
    k_small, k_big = jax.random.split(key)

    # Small shape implied by the module's forward: (batch, seq, d_model).
    batch, seq, d_model = 2, 8, 32
    x = jax.random.normal(k_small, (batch, seq, d_model), dtype=jnp.float32)
    out = jax.block_until_ready(positional_encoding_add(x))
    ref = _reference(x)
    assert out.shape == (batch, seq, d_model)
    assert jnp.allclose(out, ref, atol=1e-5, rtol=1e-5), "small-shape mismatch vs reference"

    # Larger shape: multiple sequence tiles with a ragged tail (S=320, TS=128),
    # PE re-DMA skip across the inner batch axis, lane-dense d_model.
    x2 = jax.random.normal(k_big, (2, 320, 128), dtype=jnp.float32)
    out2 = jax.block_until_ready(
        positional_encoding_add(x2, target_block_bytes=64 * 1024))
    ref2 = _reference(x2)
    assert jnp.allclose(out2, ref2, atol=1e-5, rtol=1e-5), "tiled-shape mismatch vs reference"

    print("KERNEL_OK")
</pallas_src>

<mosaic_0001>
module attributes {stable_mosaic.version = 11 : i64} {
  func.func @_pe_add_kernel(%arg0: i32, %arg1: i32, %arg2: memref<1x8x32xf32, #tpu.memory_space<vmem>>, %arg3: memref<8x32xf32, #tpu.memory_space<vmem>>, %arg4: memref<1x8x32xf32, #tpu.memory_space<vmem>>) attributes {dimension_semantics = [#tpu.dimension_semantics<parallel>, #tpu.dimension_semantics<parallel>], iteration_bounds = array<i64: 1, 2>, scalar_prefetch = 0 : i64, scratch_operands = 0 : i64, tpu.core_type = #tpu.core_type<tc>, window_params = [{transform_indices = @transform_0, window_bounds = array<i64: 1, 8, 32>}, {transform_indices = @transform_1, window_bounds = array<i64: 8, 32>}, {transform_indices = @transform_2, window_bounds = array<i64: 1, 8, 32>}]} {
    %c0 = arith.constant 0 : index
    %c0_0 = arith.constant 0 : index
    %c0_1 = arith.constant 0 : index
    %0 = vector.load %arg2[%c0, %c0_0, %c0_1] : memref<1x8x32xf32, #tpu.memory_space<vmem>>, vector<1x8x32xf32>
    %1 = vector.shape_cast %0 : vector<1x8x32xf32> to vector<8x32xf32>
    %c0_2 = arith.constant 0 : index
    %c0_3 = arith.constant 0 : index
    %2 = vector.load %arg3[%c0_2, %c0_3] : memref<8x32xf32, #tpu.memory_space<vmem>>, vector<8x32xf32>
    %3 = arith.addf %1, %2 : vector<8x32xf32>
    %c0_4 = arith.constant 0 : index
    %c0_5 = arith.constant 0 : index
    %c0_6 = arith.constant 0 : index
    %4 = vector.load %arg4[%c0_4, %c0_5, %c0_6] : memref<1x8x32xf32, #tpu.memory_space<vmem>>, vector<1x8x32xf32>
    %5 = vector.shape_cast %4 : vector<1x8x32xf32> to vector<8x32xf32>
    %6 = vector.shape_cast %3 : vector<8x32xf32> to vector<1x8x32xf32>
    tpu.vector_store %arg4[%c0_4, %c0_5, %c0_6], %6 {strides = array<i32>} : memref<1x8x32xf32, #tpu.memory_space<vmem>>, vector<1x8x32xf32>,
    return
  }
  func.func @transform_0(%arg0: i32, %arg1: i32) -> (i32, i32, i32) {
    %c0_i32 = arith.constant 0 : i32
    %c0_i32_0 = arith.constant 0 : i32
    return %arg1, %arg0, %c0_i32 : i32, i32, i32
  }
  func.func @transform_1(%arg0: i32, %arg1: i32) -> (i32, i32) {
    %c0_i32 = arith.constant 0 : i32
    %c0_i32_0 = arith.constant 0 : i32
    return %arg0, %c0_i32 : i32, i32
  }
  func.func @transform_2(%arg0: i32, %arg1: i32) -> (i32, i32, i32) {
    %c0_i32 = arith.constant 0 : i32
    %c0_i32_0 = arith.constant 0 : i32
    return %arg1, %arg0, %c0_i32 : i32, i32, i32
  }
}

</mosaic_0001>

<bundles_post_ra>
// kernel: tpu_custom_call.1
= control target key start
LH: loop header
LB: loop body
LE: loop exit
PB: predicated region body
PF: predicated region fallthrough
CT: control target
= control target key end

     0   :  { %7 = vsyncpa [#allocation3], 0  ;;  %s715_s0 = inlined_call_operand.hbm [shape: f32[2,8,32], index: 0, kind: input, shape index: {}]   ;;  %s716_s1 = inlined_call_operand.hbm [shape: f32[8,32], index: 1, kind: input, shape index: {}]   ;;  %s717_s2 = inlined_call_operand.hbm [shape: f32[2,8,32], index: 2, kind: output, shape index: {}]  }
   0x1   :  { %9 = vsyncpa [#allocation3 + $0x1], 0 }
   0x2   :  { %10 = vsyncpa [#allocation6], 0 }
   0x3   :  { %11 = vsyncpa [#allocation4], 0 }
   0x4   :  { %13 = vsyncpa [#allocation4 + $0x1], 0  ;;  %s566_s9 = smov 0   ;;  %s568_s10 = smov 0  }
   0x5   :  { %s570_s11 = smov 0   ;;  %s572_s12 = smov 0  }
   0x6   :  { %s574_s13 = smov 0   ;;  %s576_s14 = smov 0  }
   0x7 LB: > { %s314_s15 = sadd.s32 4294967295, %s548_s14   ;;  %s315_s16 = sadd.s32 4294967294, %s548_s14   ;;  %s548_s14 = sphi %s576_s14, %s19_s14   ;;  %s544_s13 = sphi %s574_s13, %s729_s13   ;;  %s540_s12 = sphi %s572_s12, %s728_s12   ;;  %s536_s11 = sphi %s570_s11, %s727_s11   ;;  %s532_s10 = sphi %s568_s10, %s726_s10   ;;  %s528_s9 = sphi %s566_s9, %s725_s9  }
   0x8   : > { %p53_p0 = scmp.ne.s32.totalorder %s532_s10, %s528_s9  ;;  %p600_p1 = scmp.eq.s32.totalorder %s314_s15, 0 }
   0x9   : > { %p604_p2 = scmp.eq.s32.totalorder %s314_s15, 1  ;;  %p111_p3 = scmp.eq.s32.totalorder %s315_s16, 1 }
   0xa   : > { %p610_p4 = por %p600_p1, %p53_p0  ;;  %p316_p5 = scmp.ge.s32.totalorder %s548_s14, 1 }
   0xb   : > { %p615_p6 = por %p111_p3, %p53_p0  ;;  %p118_p7 = scmp.lt.s32.totalorder %s548_s14, 3 }
   0xc   : > { %s132_s23 = sshll.u32 %s716_s1, 4  ;;  %p318_p9 = scmp.ge.s32.totalorder %s548_s14, 2  ;;  %s133_s23 = int_to_ptr.hbm [resolvable:$true] %s132_s23 }
   0xd   : > { %p623_p8 = pnand %p316_p5, %p118_p7  ;;  %s550_s25 = smov [#allocation5]  }
   0xe   : > { %s134_s26 = sshll.u32 %s550_s25, 4  ;;  %s28_s27 = sadd.s32 1, %s544_s13  ;;  %s135_s26 = int_to_ptr.vmem [resolvable:$true] %s134_s26 }
   0xf   : > { %p337_p10 = pneg %p623_p8  ;;  %p29_p12 = scmp.ge.s32.totalorder %s28_s27, 2 }
  0x10   : > { %s40_s28 = sadd.s32 1, %s536_s11  ;;  %p47_p13 = scmp.ne.s32.totalorder %s536_s11, %s532_s10 }
  0x11   : > { %p338_p11 = pnand %p337_p10, %p600_p1  ;;  %p48_p0 = scmp.eq.s32.totalorder %s548_s14, 0 }
  0x12   : > { %s731_s27 = smov (%p29_p12, %s28_s27), 0  ;;  %p645_p5 = por %p604_p2, %p47_p13 }
  0x13   : > { %340 = dma.hbm_to_vmem [thread:$0]  (!%p338_p11), %s133_s23, 128, %s135_s26, [#allocation6]  }
  0x14   : > { %p639_p3 = por %p48_p0, %p47_p13  ;;  %s35_s3 = ssub.s32 %s544_s13, %s731_s27 }
  0x15   : > { %p350_p7 = scmp.lt.s32.totalorder %s548_s14, 2  ;;  %p38_p10 = scmp.eq.s32.totalorder %s35_s3, 0 }
  0x16   : > { %s145_s4 = sand.u32 1, %s536_s11   ;;  %s320_s7 = sshll.u32 %s544_s13, 3 }
  0x17   : > { %s319_s5 = sshll.u32 %s145_s4, 3  ;;  %s154_s16 = scalar_lea.hbm %s715_s0, %s320_s7 }
  0x18   : > { %s654_s6 = scalar_select %p38_p10, %s536_s11, %s40_s28  }
  0x19   : > { %s149_s21 = scalar_lea.vmem [#allocation2], %s319_s5  ;;  %s156_s18 = sshll.u32 %s154_s16, 4  ;;  %s157_s18 = int_to_ptr.hbm [resolvable:$true] %s156_s18 }
  0x1a   : > { %s158_s22 = sshll.u32 %s149_s21, 4  ;;  %p342_p2 = pnand %p350_p7, %p639_p3  ;;  %s159_s22 = int_to_ptr.vmem [resolvable:$true] %s158_s22 }
  0x1b   : > { %s146_s23 = scalar_lea.sflag [#allocation3], %s145_s4  ;;  %167 = sbr.rel (%p623_p8) target bundleno = 50 (0x32), region = 28 }
  0x1c   : > { %344 = dma.hbm_to_vmem [thread:$0]  (!%p342_p2), %s157_s18, 128, %s159_s22, %s146_s23  }
  0x1d   : > { %s665_s25 = sand.u32 (!%p623_p8), 1, %s532_s10  }
  0x1e   : > { %s322_s26 = sshll.u32 (!%p623_p8), %s665_s25, 3  ;;  %s170_s28 = scalar_lea.sflag (!%p623_p8), [#allocation3], %s665_s25 }
  0x1f   : > { %s173_s3 = scalar_lea.vmem (!%p623_p8), [#allocation2], %s322_s26 }
  0x20   : > { %515 = dma.done.wait (%p610_p4), %s170_s28, 128  }
  0x21   : > { %517 = vsyncadd (%p610_p4), %s170_s28, 4294967168 }
  0x22   : > { %519 = dma.done.wait (%p600_p1), [#allocation6], 128  }
  0x23   : > { %521 = vsyncadd (%p600_p1), [#allocation6], 4294967168  ;;  %s326_s24 = sshll.u32 %s540_s12, 3  ;;  %s199_s7 = scalar_lea.vmem [#allocation7], %s322_s26  ;;  %v200_v0 = vld [vmem:[%s173_s3] sm:$0xff]  ;;  %v201_v1 = vld [vmem:[#allocation5] sm:$0xff] }
  0x24   : > { %s217_s5 = scalar_lea.hbm %s717_s2, %s326_s24  ;;  %s219_s8 = sshll.u32 %s199_s7, 4  ;;  %vm203_vm0 = vcmask 261120   ;;  %v202_v2 = vadd.f32 %v201_v1, %v200_v0  ;;  %s220_s8 = int_to_ptr.vmem [resolvable:$true] %s219_s8 }
  0x25   : > { %s221_s15 = sshll.u32 %s217_s5, 4  ;;  %s206_s17 = scalar_lea.sflag [#allocation4], %s665_s25  ;;  %s222_s15 = int_to_ptr.hbm [resolvable:$true] %s221_s15 }
  0x26   : > { %204 = vst.msk [vmem:[%s199_s7] sm:$0xff] %vm203_vm0, %v202_v2  ;;  %s476_s19 = sshra.s32 %s222_s15, 4  ;;  %s482_s22 = scalar_lea.hbm %s717_s2, 16  ;;  %s477_s19 = int_to_ptr.hbm [resolvable:$true] %s476_s19 }
  0x27   : > { %s478_s16 = scalar_lea.hbm %s477_s19, 8  ;;  %p483_p11 = scmp.lt.s32.totalorder %s477_s19, %s717_s2 }
  0x28   : > { %p479_p1 = scmp.ne.s32.totalorder %s477_s19, %s478_s16  ;;  %p484_p12 = scmp.lt.s32.totalorder %s482_s22, %s478_s16 }
  0x2a   : > { %p480_p4 = pnand %p479_p1, %p645_p5  ;;  %p485_p13 = por %p484_p12, %p483_p11 }
  0x2c   : > { %p481_p8 = pneg %p480_p4 }
  0x2e   : > { %p486_p0 = pnand %p485_p13, %p481_p8 }
  0x30   : > { %489 = shalt.err (!%p486_p0)
}
  0x31   : > { %335 = dma.vmem_to_hbm [thread:$0]  (%p645_p5), %s220_s8, 128, %s222_s15, %s206_s17  }
  0x32 PF: > { %s233_s25 = sand.u32 1, %s528_s9   ;;  %p346_p3 = pnand %p318_p9, %p615_p6 }
  0x33   : > { %s234_s26 = scalar_lea.sflag [#allocation4], %s233_s25 }
  0x34   : > { %p347_p7 = pneg %p346_p3 }
  0x36   : > { %523 = dma.done.wait (%p347_p7), %s234_s26, 128  }
  0x37   : > { %525 = vsyncadd (%p347_p7), %s234_s26, 4294967168  ;;  %s19_s14 = sadd.s32 1, %s548_s14   ;;  %s725_s9 = smov %s532_s10 }
  0x38   : > { %p16_p10 = scmp.ge.s32.totalorder %s19_s14, 4   ;;  %s726_s10 = smov %s536_s11 }
  0x39   : > { %s727_s11 = smov %s654_s6  ;;  %s728_s12 = smov %s544_s13 }
  0x3a   : > { %s729_s13 = smov %s731_s27  ;;  %18 = sbr.rel (!%p16_p10) target bundleno = 7 (0x7), region = 78 }
  0x3f   :  { %240 = vsyncpa [#allocation3], 1 }
  0x40   :  { %242 = vsyncpa [#allocation3 + $0x1], 1 }
  0x41   :  { %243 = vsyncpa [#allocation6], 1 }
  0x42   :  { %244 = vsyncpa [#allocation4], 1 }
  0x43   :  { %246 = vsyncpa [#allocation4 + $0x1], 1 }

</bundles_post_ra>
